<compile_context>
chip_gen: v7x
topology: tpu7x:2x2x1
jax: 0.10.0
libtpu: 0.0.40
codegen_flags: <defaults>
</compile_context>

<pallas_src>
import functools

import jax
import jax.numpy as jnp
from jax import lax
from jax.experimental import pallas as pl
from jax.experimental.pallas import tpu as pltpu


def _lstm_fused_kernel(ids_ref, table_ref, whh_ref, wout_ref, bout_ref, o_ref,
                       *, seq_len, batch_pad):
    """Fused embedding-projection gather + LSTM recurrence + mean + linear head.

    ids_ref:   (T*Bp, 1) int32  time-major token ids, batch padded to Bp (=8)
    table_ref: (Vp, 4H)  bf16   emb @ W_ih.T + (b_ih + b_hh), zero-padded rows
    whh_ref:   (H, 4H)   bf16   W_hh.T
    wout_ref:  (H, 128)  f32    W_out.T zero-padded to 128 lanes
    bout_ref:  (1, 128)  f32    b_out zero-padded to 128 lanes
    o_ref:     (Bp, 128) f32    logits live in lanes [0, 2)
    """
    T, Bp = seq_len, batch_pad
    H = whh_ref.shape[0]
    Vp = table_ref.shape[0]

    # ---- fused embedding gather + input projection (one MXU pass) ----------
    ids = ids_ref[...]                                            # (T*Bp, 1) i32
    iota = lax.broadcasted_iota(jnp.int32, (T * Bp, Vp), 1)
    onehot = jnp.where(ids == iota, 1.0, 0.0).astype(jnp.bfloat16)
    xz = jnp.dot(onehot, table_ref[...],
                 preferred_element_type=jnp.float32)              # (T*Bp, 4H) f32

    whh = whh_ref[...]                                            # (H, 4H) bf16

    # ---- recurrence: T static -> fully unrolled, static sublane slices -----
    h = jnp.zeros((Bp, H), jnp.float32)
    c = jnp.zeros((Bp, H), jnp.float32)
    acc = jnp.zeros((Bp, H), jnp.float32)
    for t in range(T):
        z = xz[t * Bp:(t + 1) * Bp, :] + jnp.dot(
            h.astype(jnp.bfloat16), whh, preferred_element_type=jnp.float32)
        # Two full-vreg EUP pushes, then lane-slice per gate.
        sig = jax.nn.sigmoid(z)
        tnh = jnp.tanh(z)
        # PyTorch gate order: input, forget, cell(g), output.
        i = sig[:, 0 * H:1 * H]
        f = sig[:, 1 * H:2 * H]
        g = tnh[:, 2 * H:3 * H]
        o = sig[:, 3 * H:4 * H]
        c = f * c + i * g
        h = o * jnp.tanh(c)
        acc = acc + h

    mean_h = acc * (1.0 / T)                                      # lstm_out.mean(dim=1)
    out = jnp.dot(mean_h, wout_ref[...], preferred_element_type=jnp.float32)
    o_ref[...] = out + bout_ref[...]                              # (Bp,128) unmasked store


def prepare_params(params):
    """One-time, call-invariant parameter preparation (hoisted out of forward)."""
    emb = params["embeddings"].astype(jnp.float32)                # (V, E)
    w_ih = params["w_ih"].astype(jnp.float32)                     # (4H, E)
    w_hh = params["w_hh"].astype(jnp.float32)                     # (4H, H)
    h4 = w_hh.shape[0]
    H = h4 // 4
    V = emb.shape[0]
    v_pad = ((V + 127) // 128) * 128

    # Fused per-token projection table with both biases folded in.
    table = emb @ w_ih.T + (params["b_ih"] + params["b_hh"])      # (V, 4H) f32
    table_pad = jnp.zeros((v_pad, h4), jnp.float32).at[:V].set(table)

    wout_pad = jnp.zeros((H, 128), jnp.float32).at[:, :2].set(params["w_out"].T)
    bout_pad = jnp.zeros((1, 128), jnp.float32).at[0, :2].set(params["b_out"])

    return {
        "table": table_pad.astype(jnp.bfloat16),                  # (Vp, 4H) bf16
        "whh": w_hh.T.astype(jnp.bfloat16),                       # (H, 4H)  bf16
        "wout": wout_pad,                                         # (H, 128) f32
        "bout": bout_pad,                                         # (1, 128) f32
    }


def lstm_forward(x_indx, prep):
    """Pallas-backed forward pass equivalent to LSTM.forward(x_indx)."""
    B, T = x_indx.shape
    b_pad = ((max(B, 8) + 7) // 8) * 8
    # Tiny int-index layout plumbing (fuses into one trivial op under jit):
    # time-major, batch zero-padded (pad rows read token 0; never emitted).
    ids = jnp.zeros((T, b_pad), jnp.int32).at[:, :B].set(x_indx.T)
    ids = ids.reshape(T * b_pad, 1)

    vmem = pl.BlockSpec(memory_space=pltpu.MemorySpace.VMEM)
    kernel = functools.partial(_lstm_fused_kernel, seq_len=T, batch_pad=b_pad)
    out = pl.pallas_call(
        kernel,
        out_shape=jax.ShapeDtypeStruct((b_pad, 128), jnp.float32),
        in_specs=[vmem] * 5,
        out_specs=vmem,
    )(ids, prep["table"], prep["whh"], prep["wout"], prep["bout"])
    return out[:B, :2]


def lstm_forward_ref(x_indx, params):
    """Pure-JAX f32 reference mirroring the PyTorch forward semantics."""
    x = jnp.take(params["embeddings"], x_indx, axis=0)            # (B, T, E)
    B, T, _ = x.shape
    H = params["w_hh"].shape[1]
    wih_t = params["w_ih"].T
    whh_t = params["w_hh"].T
    b = params["b_ih"] + params["b_hh"]
    h = jnp.zeros((B, H), jnp.float32)
    c = jnp.zeros((B, H), jnp.float32)
    hs = []
    for t in range(T):
        z = x[:, t, :] @ wih_t + h @ whh_t + b
        i = jax.nn.sigmoid(z[:, :H])
        f = jax.nn.sigmoid(z[:, H:2 * H])
        g = jnp.tanh(z[:, 2 * H:3 * H])
        o = jax.nn.sigmoid(z[:, 3 * H:])
        c = f * c + i * g
        h = o * jnp.tanh(c)
        hs.append(h)
    mean_h = jnp.stack(hs, axis=1).mean(axis=1)
    return mean_h @ params["w_out"].T + params["b_out"]


if __name__ == "__main__":
    V, E, H, B, T = 50, 300, 32, 2, 8     # vocab, embed(=LSTM input 300), hidden, batch, seq
    key = jax.random.PRNGKey(0)
    ks = jax.random.split(key, 8)
    s = float(1.0 / (H ** 0.5))           # PyTorch-style uniform init scale
    params = {
        "embeddings": jax.random.normal(ks[0], (V, E), jnp.float32),
        "w_ih": jax.random.uniform(ks[1], (4 * H, E), jnp.float32, -s, s),
        "w_hh": jax.random.uniform(ks[2], (4 * H, H), jnp.float32, -s, s),
        "b_ih": jax.random.uniform(ks[3], (4 * H,), jnp.float32, -s, s),
        "b_hh": jax.random.uniform(ks[4], (4 * H,), jnp.float32, -s, s),
        "w_out": jax.random.uniform(ks[5], (2, H), jnp.float32, -s, s),
        "b_out": jax.random.uniform(ks[6], (2,), jnp.float32, -s, s),
    }
    x_indx = jax.random.randint(ks[7], (B, T), 0, V, dtype=jnp.int32)

    # One-time parameter prep (not part of the per-call forward path).
    prep = jax.tree_util.tree_map(jax.block_until_ready, prepare_params(params))

    fwd = jax.jit(lstm_forward)
    out = jax.block_until_ready(fwd(x_indx, prep))
    ref = lstm_forward_ref(x_indx, params)

    assert out.shape == (B, 2), out.shape
    # Tolerance sized for bf16 MXU-operand quantization (projection table,
    # recurrent h); all accumulation and gate/cell math is f32.
    assert jnp.allclose(out, ref, rtol=2e-2, atol=2e-2), (out, ref)
    print("KERNEL_OK")
</pallas_src>

<mosaic_0001>
module attributes {stable_mosaic.version = 11 : i64} {
  func.func @_lstm_fused_kernel(%arg0: memref<64x1xi32, #tpu.memory_space<vmem>>, %arg1: memref<128x128xbf16, #tpu.memory_space<vmem>>, %arg2: memref<32x128xbf16, #tpu.memory_space<vmem>>, %arg3: memref<32x128xf32, #tpu.memory_space<vmem>>, %arg4: memref<1x128xf32, #tpu.memory_space<vmem>>, %arg5: memref<8x128xf32, #tpu.memory_space<vmem>>) attributes {dimension_semantics = [], scalar_prefetch = 0 : i64, scratch_operands = 0 : i64, tpu.core_type = #tpu.core_type<tc>} {
    %c0 = arith.constant 0 : index
    %c0_0 = arith.constant 0 : index
    %0 = vector.load %arg0[%c0, %c0_0] : memref<64x1xi32, #tpu.memory_space<vmem>>, vector<64x1xi32>
    %1 = tpu.iota {dimensions = array<i32: 1>} : vector<64x128xi32>
    %2 = vector.broadcast %0 : vector<64x1xi32> to vector<64x128xi32>
    %3 = arith.cmpi eq, %2, %1 : vector<64x128xi32>
    %cst = arith.constant 1.000000e+00 : f32
    %cst_1 = arith.constant 0.000000e+00 : f32
    %4 = vector.broadcast %cst : f32 to vector<64x128xf32>
    %5 = vector.broadcast %cst_1 : f32 to vector<64x128xf32>
    %6 = arith.select %3, %4, %5 : vector<64x128xi1>, vector<64x128xf32>
    %7 = arith.truncf %6 : vector<64x128xf32> to vector<64x128xbf16>
    %c0_2 = arith.constant 0 : index
    %c0_3 = arith.constant 0 : index
    %8 = vector.load %arg1[%c0_2, %c0_3] : memref<128x128xbf16, #tpu.memory_space<vmem>>, vector<128x128xbf16>
    %cst_4 = arith.constant dense<0.000000e+00> : vector<64x128xf32>
    %9 = tpu.matmul %7, %8, %cst_4 {dimension_numbers = #tpu.dot_dimension_numbers<[1], [0], [0], [1], [0, 0, 1, 1], [], []>} : vector<64x128xbf16>, vector<128x128xbf16>, vector<64x128xf32> -> vector<64x128xf32>
    %c0_5 = arith.constant 0 : index
    %c0_6 = arith.constant 0 : index
    %10 = vector.load %arg2[%c0_5, %c0_6] : memref<32x128xbf16, #tpu.memory_space<vmem>>, vector<32x128xbf16>
    %cst_7 = arith.constant 0.000000e+00 : f32
    %11 = vector.broadcast %cst_7 : f32 to vector<8x32xf32>
    %cst_8 = arith.constant 0.000000e+00 : f32
    %12 = vector.broadcast %cst_8 : f32 to vector<8x32xf32>
    %cst_9 = arith.constant 0.000000e+00 : f32
    %13 = vector.broadcast %cst_9 : f32 to vector<8x32xf32>
    %14 = vector.extract_strided_slice %9 {offsets = [0, 0], sizes = [8, 128], strides = [1, 1]} : vector<64x128xf32> to vector<8x128xf32>
    %15 = arith.truncf %11 : vector<8x32xf32> to vector<8x32xbf16>
    %cst_10 = arith.constant dense<0.000000e+00> : vector<8x128xf32>
    %16 = tpu.matmul %15, %10, %cst_10 {dimension_numbers = #tpu.dot_dimension_numbers<[1], [0], [0], [1], [0, 0, 1, 1], [], []>} : vector<8x32xbf16>, vector<32x128xbf16>, vector<8x128xf32> -> vector<8x128xf32>
    %17 = arith.addf %14, %16 : vector<8x128xf32>
    %18 = arith.negf %17 : vector<8x128xf32>
    %19 = math.exp %18 : vector<8x128xf32>
    %cst_11 = arith.constant 1.000000e+00 : f32
    %20 = vector.broadcast %cst_11 : f32 to vector<8x128xf32>
    %21 = arith.addf %20, %19 : vector<8x128xf32>
    %22 = arith.divf %20, %21 : vector<8x128xf32>
    %23 = math.tanh %17 : vector<8x128xf32>
    %24 = vector.extract_strided_slice %22 {offsets = [0, 0], sizes = [8, 32], strides = [1, 1]} : vector<8x128xf32> to vector<8x32xf32>
    %25 = vector.extract_strided_slice %22 {offsets = [0, 32], sizes = [8, 32], strides = [1, 1]} : vector<8x128xf32> to vector<8x32xf32>
    %26 = vector.extract_strided_slice %23 {offsets = [0, 64], sizes = [8, 32], strides = [1, 1]} : vector<8x128xf32> to vector<8x32xf32>
    %27 = vector.extract_strided_slice %22 {offsets = [0, 96], sizes = [8, 32], strides = [1, 1]} : vector<8x128xf32> to vector<8x32xf32>
    %28 = arith.mulf %25, %12 : vector<8x32xf32>
    %29 = arith.mulf %24, %26 : vector<8x32xf32>
    %30 = arith.addf %28, %29 : vector<8x32xf32>
    %31 = math.tanh %30 : vector<8x32xf32>
    %32 = arith.mulf %27, %31 : vector<8x32xf32>
    %33 = arith.addf %13, %32 : vector<8x32xf32>
    %34 = vector.extract_strided_slice %9 {offsets = [8, 0], sizes = [8, 128], strides = [1, 1]} : vector<64x128xf32> to vector<8x128xf32>
    %35 = arith.truncf %32 : vector<8x32xf32> to vector<8x32xbf16>
    %cst_12 = arith.constant dense<0.000000e+00> : vector<8x128xf32>
    %36 = tpu.matmul %35, %10, %cst_12 {dimension_numbers = #tpu.dot_dimension_numbers<[1], [0], [0], [1], [0, 0, 1, 1], [], []>} : vector<8x32xbf16>, vector<32x128xbf16>, vector<8x128xf32> -> vector<8x128xf32>
    %37 = arith.addf %34, %36 : vector<8x128xf32>
    %38 = arith.negf %37 : vector<8x128xf32>
    %39 = math.exp %38 : vector<8x128xf32>
    %cst_13 = arith.constant 1.000000e+00 : f32
    %40 = vector.broadcast %cst_13 : f32 to vector<8x128xf32>
    %41 = arith.addf %40, %39 : vector<8x128xf32>
    %42 = arith.divf %40, %41 : vector<8x128xf32>
    %43 = math.tanh %37 : vector<8x128xf32>
    %44 = vector.extract_strided_slice %42 {offsets = [0, 0], sizes = [8, 32], strides = [1, 1]} : vector<8x128xf32> to vector<8x32xf32>
    %45 = vector.extract_strided_slice %42 {offsets = [0, 32], sizes = [8, 32], strides = [1, 1]} : vector<8x128xf32> to vector<8x32xf32>
    %46 = vector.extract_strided_slice %43 {offsets = [0, 64], sizes = [8, 32], strides = [1, 1]} : vector<8x128xf32> to vector<8x32xf32>
    %47 = vector.extract_strided_slice %42 {offsets = [0, 96], sizes = [8, 32], strides = [1, 1]} : vector<8x128xf32> to vector<8x32xf32>
    %48 = arith.mulf %45, %30 : vector<8x32xf32>
    %49 = arith.mulf %44, %46 : vector<8x32xf32>
    %50 = arith.addf %48, %49 : vector<8x32xf32>
    %51 = math.tanh %50 : vector<8x32xf32>
    %52 = arith.mulf %47, %51 : vector<8x32xf32>
    %53 = arith.addf %33, %52 : vector<8x32xf32>
    %54 = vector.extract_strided_slice %9 {offsets = [16, 0], sizes = [8, 128], strides = [1, 1]} : vector<64x128xf32> to vector<8x128xf32>
    %55 = arith.truncf %52 : vector<8x32xf32> to vector<8x32xbf16>
    %cst_14 = arith.constant dense<0.000000e+00> : vector<8x128xf32>
    %56 = tpu.matmul %55, %10, %cst_14 {dimension_numbers = #tpu.dot_dimension_numbers<[1], [0], [0], [1], [0, 0, 1, 1], [], []>} : vector<8x32xbf16>, vector<32x128xbf16>, vector<8x128xf32> -> vector<8x128xf32>
    %57 = arith.addf %54, %56 : vector<8x128xf32>
    %58 = arith.negf %57 : vector<8x128xf32>
    %59 = math.exp %58 : vector<8x128xf32>
    %cst_15 = arith.constant 1.000000e+00 : f32
    %60 = vector.broadcast %cst_15 : f32 to vector<8x128xf32>
    %61 = arith.addf %60, %59 : vector<8x128xf32>
    %62 = arith.divf %60, %61 : vector<8x128xf32>
    %63 = math.tanh %57 : vector<8x128xf32>
    %64 = vector.extract_strided_slice %62 {offsets = [0, 0], sizes = [8, 32], strides = [1, 1]} : vector<8x128xf32> to vector<8x32xf32>
    %65 = vector.extract_strided_slice %62 {offsets = [0, 32], sizes = [8, 32], strides = [1, 1]} : vector<8x128xf32> to vector<8x32xf32>
    %66 = vector.extract_strided_slice %63 {offsets = [0, 64], sizes = [8, 32], strides = [1, 1]} : vector<8x128xf32> to vector<8x32xf32>
    %67 = vector.extract_strided_slice %62 {offsets = [0, 96], sizes = [8, 32], strides = [1, 1]} : vector<8x128xf32> to vector<8x32xf32>
    %68 = arith.mulf %65, %50 : vector<8x32xf32>
    %69 = arith.mulf %64, %66 : vector<8x32xf32>
    %70 = arith.addf %68, %69 : vector<8x32xf32>
    %71 = math.tanh %70 : vector<8x32xf32>
    %72 = arith.mulf %67, %71 : vector<8x32xf32>
    %73 = arith.addf %53, %72 : vector<8x32xf32>
    %74 = vector.extract_strided_slice %9 {offsets = [24, 0], sizes = [8, 128], strides = [1, 1]} : vector<64x128xf32> to vector<8x128xf32>
    %75 = arith.truncf %72 : vector<8x32xf32> to vector<8x32xbf16>
    %cst_16 = arith.constant dense<0.000000e+00> : vector<8x128xf32>
    %76 = tpu.matmul %75, %10, %cst_16 {dimension_numbers = #tpu.dot_dimension_numbers<[1], [0], [0], [1], [0, 0, 1, 1], [], []>} : vector<8x32xbf16>, vector<32x128xbf16>, vector<8x128xf32> -> vector<8x128xf32>
    %77 = arith.addf %74, %76 : vector<8x128xf32>
    %78 = arith.negf %77 : vector<8x128xf32>
    %79 = math.exp %78 : vector<8x128xf32>
    %cst_17 = arith.constant 1.000000e+00 : f32
    %80 = vector.broadcast %cst_17 : f32 to vector<8x128xf32>
    %81 = arith.addf %80, %79 : vector<8x128xf32>
    %82 = arith.divf %80, %81 : vector<8x128xf32>
    %83 = math.tanh %77 : vector<8x128xf32>
    %84 = vector.extract_strided_slice %82 {offsets = [0, 0], sizes = [8, 32], strides = [1, 1]} : vector<8x128xf32> to vector<8x32xf32>
    %85 = vector.extract_strided_slice %82 {offsets = [0, 32], sizes = [8, 32], strides = [1, 1]} : vector<8x128xf32> to vector<8x32xf32>
    %86 = vector.extract_strided_slice %83 {offsets = [0, 64], sizes = [8, 32], strides = [1, 1]} : vector<8x128xf32> to vector<8x32xf32>
    %87 = vector.extract_strided_slice %82 {offsets = [0, 96], sizes = [8, 32], strides = [1, 1]} : vector<8x128xf32> to vector<8x32xf32>
    %88 = arith.mulf %85, %70 : vector<8x32xf32>
    %89 = arith.mulf %84, %86 : vector<8x32xf32>
    %90 = arith.addf %88, %89 : vector<8x32xf32>
    %91 = math.tanh %90 : vector<8x32xf32>
    %92 = arith.mulf %87, %91 : vector<8x32xf32>
    %93 = arith.addf %73, %92 : vector<8x32xf32>
    %94 = vector.extract_strided_slice %9 {offsets = [32, 0], sizes = [8, 128], strides = [1, 1]} : vector<64x128xf32> to vector<8x128xf32>
    %95 = arith.truncf %92 : vector<8x32xf32> to vector<8x32xbf16>
    %cst_18 = arith.constant dense<0.000000e+00> : vector<8x128xf32>
    %96 = tpu.matmul %95, %10, %cst_18 {dimension_numbers = #tpu.dot_dimension_numbers<[1], [0], [0], [1], [0, 0, 1, 1], [], []>} : vector<8x32xbf16>, vector<32x128xbf16>, vector<8x128xf32> -> vector<8x128xf32>
    %97 = arith.addf %94, %96 : vector<8x128xf32>
    %98 = arith.negf %97 : vector<8x128xf32>
    %99 = math.exp %98 : vector<8x128xf32>
    %cst_19 = arith.constant 1.000000e+00 : f32
    %100 = vector.broadcast %cst_19 : f32 to vector<8x128xf32>
    %101 = arith.addf %100, %99 : vector<8x128xf32>
    %102 = arith.divf %100, %101 : vector<8x128xf32>
    %103 = math.tanh %97 : vector<8x128xf32>
    %104 = vector.extract_strided_slice %102 {offsets = [0, 0], sizes = [8, 32], strides = [1, 1]} : vector<8x128xf32> to vector<8x32xf32>
    %105 = vector.extract_strided_slice %102 {offsets = [0, 32], sizes = [8, 32], strides = [1, 1]} : vector<8x128xf32> to vector<8x32xf32>
    %106 = vector.extract_strided_slice %103 {offsets = [0, 64], sizes = [8, 32], strides = [1, 1]} : vector<8x128xf32> to vector<8x32xf32>
    %107 = vector.extract_strided_slice %102 {offsets = [0, 96], sizes = [8, 32], strides = [1, 1]} : vector<8x128xf32> to vector<8x32xf32>
    %108 = arith.mulf %105, %90 : vector<8x32xf32>
    %109 = arith.mulf %104, %106 : vector<8x32xf32>
    %110 = arith.addf %108, %109 : vector<8x32xf32>
    %111 = math.tanh %110 : vector<8x32xf32>
    %112 = arith.mulf %107, %111 : vector<8x32xf32>
    %113 = arith.addf %93, %112 : vector<8x32xf32>
    %114 = vector.extract_strided_slice %9 {offsets = [40, 0], sizes = [8, 128], strides = [1, 1]} : vector<64x128xf32> to vector<8x128xf32>
    %115 = arith.truncf %112 : vector<8x32xf32> to vector<8x32xbf16>
    %cst_20 = arith.constant dense<0.000000e+00> : vector<8x128xf32>
    %116 = tpu.matmul %115, %10, %cst_20 {dimension_numbers = #tpu.dot_dimension_numbers<[1], [0], [0], [1], [0, 0, 1, 1], [], []>} : vector<8x32xbf16>, vector<32x128xbf16>, vector<8x128xf32> -> vector<8x128xf32>
    %117 = arith.addf %114, %116 : vector<8x128xf32>
    %118 = arith.negf %117 : vector<8x128xf32>
    %119 = math.exp %118 : vector<8x128xf32>
    %cst_21 = arith.constant 1.000000e+00 : f32
    %120 = vector.broadcast %cst_21 : f32 to vector<8x128xf32>
    %121 = arith.addf %120, %119 : vector<8x128xf32>
    %122 = arith.divf %120, %121 : vector<8x128xf32>
    %123 = math.tanh %117 : vector<8x128xf32>
    %124 = vector.extract_strided_slice %122 {offsets = [0, 0], sizes = [8, 32], strides = [1, 1]} : vector<8x128xf32> to vector<8x32xf32>
    %125 = vector.extract_strided_slice %122 {offsets = [0, 32], sizes = [8, 32], strides = [1, 1]} : vector<8x128xf32> to vector<8x32xf32>
    %126 = vector.extract_strided_slice %123 {offsets = [0, 64], sizes = [8, 32], strides = [1, 1]} : vector<8x128xf32> to vector<8x32xf32>
    %127 = vector.extract_strided_slice %122 {offsets = [0, 96], sizes = [8, 32], strides = [1, 1]} : vector<8x128xf32> to vector<8x32xf32>
    %128 = arith.mulf %125, %110 : vector<8x32xf32>
    %129 = arith.mulf %124, %126 : vector<8x32xf32>
    %130 = arith.addf %128, %129 : vector<8x32xf32>
    %131 = math.tanh %130 : vector<8x32xf32>
    %132 = arith.mulf %127, %131 : vector<8x32xf32>
    %133 = arith.addf %113, %132 : vector<8x32xf32>
    %134 = vector.extract_strided_slice %9 {offsets = [48, 0], sizes = [8, 128], strides = [1, 1]} : vector<64x128xf32> to vector<8x128xf32>
    %135 = arith.truncf %132 : vector<8x32xf32> to vector<8x32xbf16>
    %cst_22 = arith.constant dense<0.000000e+00> : vector<8x128xf32>
    %136 = tpu.matmul %135, %10, %cst_22 {dimension_numbers = #tpu.dot_dimension_numbers<[1], [0], [0], [1], [0, 0, 1, 1], [], []>} : vector<8x32xbf16>, vector<32x128xbf16>, vector<8x128xf32> -> vector<8x128xf32>
    %137 = arith.addf %134, %136 : vector<8x128xf32>
    %138 = arith.negf %137 : vector<8x128xf32>
    %139 = math.exp %138 : vector<8x128xf32>
    %cst_23 = arith.constant 1.000000e+00 : f32
    %140 = vector.broadcast %cst_23 : f32 to vector<8x128xf32>
    %141 = arith.addf %140, %139 : vector<8x128xf32>
    %142 = arith.divf %140, %141 : vector<8x128xf32>
    %143 = math.tanh %137 : vector<8x128xf32>
    %144 = vector.extract_strided_slice %142 {offsets = [0, 0], sizes = [8, 32], strides = [1, 1]} : vector<8x128xf32> to vector<8x32xf32>
    %145 = vector.extract_strided_slice %142 {offsets = [0, 32], sizes = [8, 32], strides = [1, 1]} : vector<8x128xf32> to vector<8x32xf32>
    %146 = vector.extract_strided_slice %143 {offsets = [0, 64], sizes = [8, 32], strides = [1, 1]} : vector<8x128xf32> to vector<8x32xf32>
    %147 = vector.extract_strided_slice %142 {offsets = [0, 96], sizes = [8, 32], strides = [1, 1]} : vector<8x128xf32> to vector<8x32xf32>
    %148 = arith.mulf %145, %130 : vector<8x32xf32>
    %149 = arith.mulf %144, %146 : vector<8x32xf32>
    %150 = arith.addf %148, %149 : vector<8x32xf32>
    %151 = math.tanh %150 : vector<8x32xf32>
    %152 = arith.mulf %147, %151 : vector<8x32xf32>
    %153 = arith.addf %133, %152 : vector<8x32xf32>
    %154 = vector.extract_strided_slice %9 {offsets = [56, 0], sizes = [8, 128], strides = [1, 1]} : vector<64x128xf32> to vector<8x128xf32>
    %155 = arith.truncf %152 : vector<8x32xf32> to vector<8x32xbf16>
    %cst_24 = arith.constant dense<0.000000e+00> : vector<8x128xf32>
    %156 = tpu.matmul %155, %10, %cst_24 {dimension_numbers = #tpu.dot_dimension_numbers<[1], [0], [0], [1], [0, 0, 1, 1], [], []>} : vector<8x32xbf16>, vector<32x128xbf16>, vector<8x128xf32> -> vector<8x128xf32>
    %157 = arith.addf %154, %156 : vector<8x128xf32>
    %158 = arith.negf %157 : vector<8x128xf32>
    %159 = math.exp %158 : vector<8x128xf32>
    %cst_25 = arith.constant 1.000000e+00 : f32
    %160 = vector.broadcast %cst_25 : f32 to vector<8x128xf32>
    %161 = arith.addf %160, %159 : vector<8x128xf32>
    %162 = arith.divf %160, %161 : vector<8x128xf32>
    %163 = math.tanh %157 : vector<8x128xf32>
    %164 = vector.extract_strided_slice %162 {offsets = [0, 0], sizes = [8, 32], strides = [1, 1]} : vector<8x128xf32> to vector<8x32xf32>
    %165 = vector.extract_strided_slice %162 {offsets = [0, 32], sizes = [8, 32], strides = [1, 1]} : vector<8x128xf32> to vector<8x32xf32>
    %166 = vector.extract_strided_slice %163 {offsets = [0, 64], sizes = [8, 32], strides = [1, 1]} : vector<8x128xf32> to vector<8x32xf32>
    %167 = vector.extract_strided_slice %162 {offsets = [0, 96], sizes = [8, 32], strides = [1, 1]} : vector<8x128xf32> to vector<8x32xf32>
    %168 = arith.mulf %165, %150 : vector<8x32xf32>
    %169 = arith.mulf %164, %166 : vector<8x32xf32>
    %170 = arith.addf %168, %169 : vector<8x32xf32>
    %171 = math.tanh %170 : vector<8x32xf32>
    %172 = arith.mulf %167, %171 : vector<8x32xf32>
    %173 = arith.addf %153, %172 : vector<8x32xf32>
    %cst_26 = arith.constant 1.250000e-01 : f32
    %174 = vector.broadcast %cst_26 : f32 to vector<8x32xf32>
    %175 = arith.mulf %173, %174 : vector<8x32xf32>
    %c0_27 = arith.constant 0 : index
    %c0_28 = arith.constant 0 : index
    %176 = vector.load %arg3[%c0_27, %c0_28] : memref<32x128xf32, #tpu.memory_space<vmem>>, vector<32x128xf32>
    %cst_29 = arith.constant dense<0.000000e+00> : vector<8x128xf32>
    %177 = tpu.matmul %175, %176, %cst_29 {dimension_numbers = #tpu.dot_dimension_numbers<[1], [0], [0], [1], [0, 0, 1, 1], [], []>} : vector<8x32xf32>, vector<32x128xf32>, vector<8x128xf32> -> vector<8x128xf32>
    %c0_30 = arith.constant 0 : index
    %c0_31 = arith.constant 0 : index
    %178 = vector.load %arg4[%c0_30, %c0_31] : memref<1x128xf32, #tpu.memory_space<vmem>>, vector<1x128xf32>
    %179 = vector.broadcast %178 : vector<1x128xf32> to vector<8x128xf32>
    %180 = arith.addf %177, %179 : vector<8x128xf32>
    %c0_32 = arith.constant 0 : index
    %c0_33 = arith.constant 0 : index
    %181 = vector.load %arg5[%c0_32, %c0_33] : memref<8x128xf32, #tpu.memory_space<vmem>>, vector<8x128xf32>
    tpu.vector_store %arg5[%c0_32, %c0_33], %180 {strides = array<i32>} : memref<8x128xf32, #tpu.memory_space<vmem>>, vector<8x128xf32>,
    return
  }
}

</mosaic_0001>

<bundles_post_ra>
// kernel: lstm_forward.1
= control target key start
LH: loop header
LB: loop body
LE: loop exit
PB: predicated region body
PF: predicated region fallthrough
CT: control target
= control target key end

     0   :  { %v1157_v0 = vmov 0   ;;  %v1158_v6 = vmov 0.0   ;;  %vm1159_vm0 = vmmov 0   ;;  %v29_v16 = vlaneseq  ;;  %s1162_s20 = smov 32   ;;  %s1391_s0 = inlined_call_operand.vmem [shape: s32[64,1], index: 0, kind: input, shape index: {}]   ;;  %s1392_s1 = inlined_call_operand.vmem [shape: bf16[128,128], index: 1, kind: input, shape index: {}]   ;;  %s1393_s2 = inlined_call_operand.vmem [shape: bf16[32,128], index: 2, kind: input, shape index: {}]   ;;  %s1394_s3 = inlined_call_operand.vmem [shape: f32[32,128], index: 3, kind: input, shape index: {}]   ;;  %s1395_s4 = inlined_call_operand.vmem [shape: f32[1,128], index: 4, kind: input, shape index: {}]   ;;  %s1396_s5 = inlined_call_operand.vmem [shape: f32[8,128], index: 5, kind: output, shape index: {}]  }
   0x1   :  { %1082 = vset.pattern.permute.xlu1 %v1157_v0  ;;  %1081 = vset.pattern.permute.xlu0 %v1157_v0  ;;  %v23_v1 = vld [vmem:[%s1391_s0 + $0x10] sm:$0xff]  ;;  %v21_v2 = vld [vmem:[%s1391_s0] sm:$0xff]  ;;  %v24_v3 = vld [vmem:[%s1391_s0 + $0x18] sm:$0xff]  ;;  %v1160_v22 = vmov 1.0|1.0   ;;  %vm220_vm7 = vcmask 261120  }
   0x2   :  { %38 = vperm.xlu1 %1082, %v23_v1   ;;  %32 = vperm.xlu0 %1081, %v21_v2   ;;  %v22_v4 = vld [vmem:[%s1391_s0 + $0x8] sm:$0xff]  ;;  %v1083_v5 = vld [vmem:[%s1392_s1] sm:$0xff]   ;;  %v1085_v8 = vld [vmem:[%s1392_s1 + $0x10] sm:$0xff]   ;;  %v1254_v19 = vand.u32 127, %v29_v16 }
   0x3   :  { %993 = vmatprep.subr.bf16.mxu1 %v1158_v6  ;;  %v1084_v7 = vld [vmem:[%s1392_s1 + $0x8] sm:$0xff]   ;;  %969 = vmatprep.subr.bf16.mxu0 %v1083_v5  ;;  %v1221_v9 = vld [vmem:[%s1393_s2] sm:$0xff]   ;;  %v1086_v11 = vld [vmem:[%s1392_s1 + $0x18] sm:$0xff]  }
   0x4   :  { %970 = vmatpush3.bf16.msra.mxu0 %v1083_v5  ;;  %997 = vmatprep.mubr.msk.bf16.mxu1 %vm1159_vm0, %v1158_v6  ;;  %v1227_v10 = vld [vmem:[%s1393_s2 + $0x8] sm:$0xff]   ;;  %v1087_v12 = vld [vmem:[%s1392_s1 + $0x20] sm:$0xff]   ;;  %v1090_v14 = vld [vmem:[%s1392_s1 + $0x30] sm:$0xff]  }
   0x5   :  { %971 = vmatprep.subr.bf16.mxu0 %v1084_v7  ;;  %994 = vmatpush3.bf16.msra.mxu1 %v1221_v9  ;;  %v1088_v13 = vld [vmem:[%s1392_s1 + $0x28] sm:$0xff]   ;;  %v1092_v15 = vld [vmem:[%s1392_s1 + $0x38] sm:$0xff]   ;;  %s1161_s1 = smov 64  }
   0x6   :  { %41 = vperm.xlu1 %1082, %v24_v3   ;;  %35 = vperm.xlu0 %1081, %v22_v4  }
   0x7   :  { %995 = vmatprep.subr.bf16.mxu1 %v1158_v6 }
   0x8   :  { %972 = vmatpush3.bf16.msra.mxu0 %v1084_v7 }
   0x9   :  { %973 = vmatprep.subr.bf16.mxu0 %v1085_v8  ;;  %996 = vmatpush3.bf16.msra.mxu1 %v1227_v10 }
   0xa   :  { %1001 = vmatprep.subr.bf16.mxu1 %v1158_v6 }
   0xc   :  { %974 = vmatpush3.bf16.msra.mxu0 %v1085_v8  ;;  %998 = vmatmul.mubr.bf16.vlgmr.msra.gmra.mrb[0].mxu1 %v1157_v0 }
   0xd   :  { %975 = vmatprep.subr.bf16.mxu0 %v1086_v11  ;;  %1002 = vmatpush3.bf16.msra.mxu1 %v1221_v9 }
   0xe   :  { %1003 = vmatprep.subr.bf16.mxu1 %v1158_v6  ;;  %1005 = vmatprep.mubr.msk.bf16.mxu1 %vm1159_vm0, %v1158_v6 }
  0x10   :  { %976 = vmatpush3.bf16.msra.mxu0 %v1086_v11 }
  0x11   :  { %977 = vmatprep.subr.bf16.mxu0 %v1087_v12  ;;  %1004 = vmatpush3.bf16.msra.mxu1 %v1227_v10 }
  0x12   :  { %1009 = vmatprep.subr.bf16.mxu1 %v1158_v6 }
  0x14   :  { %978 = vmatpush3.bf16.msra.mxu0 %v1087_v12 }
  0x15   :  { %979 = vmatprep.subr.bf16.mxu0 %v1088_v13 }
  0x18   :  { %980 = vmatpush3.bf16.msra.mxu0 %v1088_v13 }
  0x19   :  { %981 = vmatprep.subr.bf16.mxu0 %v1090_v14 }
  0x1c   :  { %982 = vmatpush3.bf16.msra.mxu0 %v1090_v14 }
  0x1d   :  { %983 = vmatprep.subr.bf16.mxu0 %v1092_v15 }
  0x20   :  { %984 = vmatpush3.bf16.msra.mxu0 %v1092_v15 }
  0x21   :  { %1033 = vmatprep.subr.bf16.mxu0 %v1158_v6 }
  0x81   :  { %v39_v17 = vpop.permute.xlu1 %38  ;;  %v33_v18 = vpop.permute.xlu0 %32 }
  0x82   :  { %vm57_vm1 = vcmp.eq.s32.totalorder %v39_v17, %v1254_v19  ;;  %vm55_vm4 = vcmp.eq.s32.totalorder %v33_v18, %v1254_v19 }
  0x85   :  { %v42_v20 = vpop.permute.xlu1 %41  ;;  %v36_v21 = vpop.permute.xlu0 %35 }
  0x86   :  { %vm58_vm2 = vcmp.eq.s32.totalorder %v42_v20, %v1254_v19  ;;  %vm56_vm3 = vcmp.eq.s32.totalorder %v36_v21, %v1254_v19 }
  0x87   :  { %vm903_vm5 = vmpackc.low %vm58_vm2, %vm57_vm1 }
  0x88   :  { %vm901_vm6 = vmpackc.low %vm56_vm3, %vm55_vm4 }
  0x89   :  { %985 = vmatprep.mubr.msk.bf16.mxu0 %vm901_vm6, %v1160_v22 }
  0x8a   :  { %986 = vmatmul.mubr.msk.bf16.vlgmr.msra.gmra.mrb[0].mxu0 %vm903_vm5, %v1160_v22 }
  0x8b   :  { %1034 = vmatpush3.bf16.msra.mxu0 %v1221_v9 }
  0x8c   :  { %1035 = vmatprep.subr.bf16.mxu0 %v1158_v6 }
  0x8f   :  { %1036 = vmatpush3.bf16.msra.mxu0 %v1227_v10 }
  0x90   :  { %1049 = vmatprep.subr.bf16.mxu0 %v1158_v6 }
  0xdf   :  { %v258_v23 = vpop.f32.mrb[0].mxu1 }
  0xe0   :  { %v999_v24 = vpop.f32.mrb[1].mxu1 }
  0xe1   :  { %v261_v25 = vpop.f32.mrb[2].mxu1 }
  0xe2   :  { %v1000_v26 = vpop.f32.mrb[3].mxu1 }
 0x15d   :  { %v1266_v27 = vpop.f32.mrb[0].mxu0 }
 0x15e   :  { %v173_v28 = vpop.f32.mrb[1].mxu0 }
 0x15f   :  { %v264_v29 = vadd.f32 %v258_v23, %v173_v28  ;;  %v1268_v30 = vpop.f32.mrb[2].mxu0 }
 0x160   :  { %v176_v31 = vpop.f32.mrb[3].mxu0 }
 0x161   :  { %1093 = vtanh.f32 %v264_v29  ;;  %v911_v33 = vmul.f32 -1.442695, %v264_v29 }
 0x163   :  { %1095 = vpow2.f32 %v911_v33 }
 0x16b   :  { %v1094_v32 = vpop.eup %1093 }
 0x16c   :  { %274 = vrot.lane.b32.xlu0 %v1094_v32, %s1161_s1 }
 0x16d   :  { %v1096_v34 = vpop.eup %1095 }
 0x16e   :  { %v268_v35 = vadd.f32 1.0, %v1096_v34 }
 0x170   :  { %1097 = vrcp.f32 %v268_v35 }
 0x17a   :  { %v1098_v36 = vpop.eup %1097 }
 0x17b   :  { %v272_v39 = vmul.f32 0.0, %v1098_v36 }
 0x1de   :  { %v275_v37 = vpop.permute.xlu0 %274 }
 0x1df   :  { %v277_v38 = vmul.f32 %v1098_v36, %v275_v37 }
 0x1e1   :  { %279 = vrot.lane.b32.xlu1 %v277_v38, %s1162_s20 }
 0x253   :  { %v280_v40 = vpop.permute.xlu1 %279 }
 0x254   :  { %v282_v41 = vadd.f32 %v280_v40, %v272_v39 }
 0x256   :  { %1099 = vtanh.f32 %v282_v41 }
 0x260   :  { %v1100_v42 = vpop.eup %1099 }
 0x261   :  { %285 = vrot.lane.b32.xlu0 %v1100_v42, %s1161_s1 }
 0x2d3   :  { %v286_v43 = vpop.permute.xlu0 %285 }
 0x2d4   :  { %v1273_v44 = vmul.f32 %v1098_v36, %v286_v43  ;;  %v27_v43 = vld [vmem:[%s1391_s0 + $0x30] sm:$0xff] }
 0x2d6   :  { %v290_v45 = vpack.c.bf16 %v1273_v44, %v1273_v44 }
 0x2d8   :  { %292 = vrot.lane.b32.xlu1 %v290_v45, %s1162_s20 }
 0x34a   :  { %v293_v46 = vpop.permute.xlu1 %292 }
 0x34b   :  { %1006 = vmatmul.mubr.msk.bf16.vlgmr.msra.gmra.mrb[4].mxu1 %vm220_vm7, %v293_v46 }
 0x34c   :  { %1010 = vmatpush3.bf16.msra.mxu1 %v1221_v9  ;;  %1013 = vmatprep.mubr.msk.bf16.mxu1 %vm1159_vm0, %v1158_v6 }
 0x34d   :  { %1011 = vmatprep.subr.bf16.mxu1 %v1158_v6 }
 0x350   :  { %1012 = vmatpush3.bf16.msra.mxu1 %v1227_v10 }
 0x351   :  { %1017 = vmatprep.subr.bf16.mxu1 %v1158_v6 }
 0x41e   :  { %v331_v47 = vpop.f32.mrb[4].mxu1 }
 0x41f   :  { %v337_v48 = vadd.f32 %v331_v47, %v176_v31  ;;  %v1007_v49 = vpop.f32.mrb[5].mxu1 }
 0x420   :  { %v334_v50 = vpop.f32.mrb[6].mxu1  ;;  %v28_v49 = vld [vmem:[%s1391_s0 + $0x38] sm:$0xff] }
 0x421   :  { %1101 = vtanh.f32 %v337_v48  ;;  %v1008_v51 = vpop.f32.mrb[7].mxu1  ;;  %v913_v53 = vmul.f32 -1.442695, %v337_v48  ;;  %v26_v48 = vld [vmem:[%s1391_s0 + $0x28] sm:$0xff] }
 0x423   :  { %1103 = vpow2.f32 %v913_v53 }
 0x42b   :  { %v1102_v52 = vpop.eup %1101 }
 0x42c   :  { %347 = vrot.lane.b32.xlu0 %v1102_v52, %s1161_s1 }
 0x42d   :  { %v1104_v54 = vpop.eup %1103 }
 0x42e   :  { %v341_v55 = vadd.f32 1.0, %v1104_v54 }
 0x430   :  { %1105 = vrcp.f32 %v341_v55 }
 0x43a   :  { %v1106_v56 = vpop.eup %1105 }
 0x43b   :  { %v345_v59 = vmul.f32 %v1106_v56, %v282_v41 }
 0x49e   :  { %v348_v57 = vpop.permute.xlu0 %347 }
 0x49f   :  { %v350_v58 = vmul.f32 %v1106_v56, %v348_v57 }
 0x4a1   :  { %352 = vrot.lane.b32.xlu1 %v350_v58, %s1162_s20 }
 0x513   :  { %v353_v60 = vpop.permute.xlu1 %352 }
 0x514   :  { %v355_v61 = vadd.f32 %v353_v60, %v345_v59 }
 0x516   :  { %1107 = vtanh.f32 %v355_v61 }
 0x520   :  { %v1108_v62 = vpop.eup %1107 }
 0x521   :  { %358 = vrot.lane.b32.xlu0 %v1108_v62, %s1161_s1 }
 0x593   :  { %v359_v63 = vpop.permute.xlu0 %358 }
 0x594   :  { %v361_v0 = vmul.f32 %v1106_v56, %v359_v63 }
 0x596   :  { %v363_v1 = vpack.c.bf16 %v361_v0, %v361_v0  ;;  %v362_v25 = vadd.f32 %v361_v0, %v1273_v44 }
 0x598   :  { %365 = vrot.lane.b32.xlu1 %v363_v1, %s1162_s20 }
 0x60a   :  { %v366_v2 = vpop.permute.xlu1 %365 }
 0x60b   :  { %1014 = vmatmul.mubr.msk.bf16.vlgmr.msra.gmra.mrb[8].mxu1 %vm220_vm7, %v366_v2 }
 0x60c   :  { %1018 = vmatpush3.bf16.msra.mxu1 %v1221_v9  ;;  %1021 = vmatprep.mubr.msk.bf16.mxu1 %vm1159_vm0, %v1158_v6 }
 0x60d   :  { %1019 = vmatprep.subr.bf16.mxu1 %v1158_v6 }
 0x610   :  { %1020 = vmatpush3.bf16.msra.mxu1 %v1227_v10 }
 0x611   :  { %1025 = vmatprep.subr.bf16.mxu1 %v1158_v6 }
 0x6de   :  { %v404_v3 = vpop.f32.mrb[8].mxu1 }
 0x6df   :  { %v410_v4 = vadd.f32 %v1266_v27, %v404_v3  ;;  %v1015_v5 = vpop.f32.mrb[9].mxu1 }
 0x6e0   :  { %v407_v7 = vpop.f32.mrb[10].mxu1 }
 0x6e1   :  { %1109 = vtanh.f32 %v410_v4  ;;  %v1016_v8 = vpop.f32.mrb[11].mxu1  ;;  %v915_v12 = vmul.f32 -1.442695, %v410_v4 }
 0x6e3   :  { %1111 = vpow2.f32 %v915_v12 }
 0x6eb   :  { %v1110_v11 = vpop.eup %1109 }
 0x6ec   :  { %420 = vrot.lane.b32.xlu0 %v1110_v11, %s1161_s1 }
 0x6ed   :  { %v1112_v13 = vpop.eup %1111 }
 0x6ee   :  { %v414_v14 = vadd.f32 1.0, %v1112_v13 }
 0x6f0   :  { %1113 = vrcp.f32 %v414_v14 }
 0x6fa   :  { %v1114_v15 = vpop.eup %1113 }
 0x6fb   :  { %v418_v18 = vmul.f32 %v1114_v15, %v355_v61 }
 0x75e   :  { %v421_v16 = vpop.permute.xlu0 %420 }
 0x75f   :  { %v423_v17 = vmul.f32 %v1114_v15, %v421_v16 }
 0x761   :  { %425 = vrot.lane.b32.xlu1 %v423_v17, %s1162_s20 }
 0x7d3   :  { %v426_v20 = vpop.permute.xlu1 %425 }
 0x7d4   :  { %v428_v21 = vadd.f32 %v426_v20, %v418_v18 }
 0x7d6   :  { %1115 = vtanh.f32 %v428_v21 }
 0x7e0   :  { %v1116_v23 = vpop.eup %1115 }
 0x7e1   :  { %431 = vrot.lane.b32.xlu0 %v1116_v23, %s1161_s1 }
 0x853   :  { %v432_v24 = vpop.permute.xlu0 %431 }
 0x854   :  { %v434_v26 = vmul.f32 %v1114_v15, %v432_v24 }
 0x856   :  { %v435_v27 = vadd.f32 %v434_v26, %v362_v25  ;;  %v436_v28 = vpack.c.bf16 %v434_v26, %v434_v26 }
 0x858   :  { %438 = vrot.lane.b32.xlu1 %v436_v28, %s1162_s20 }
 0x8ca   :  { %v439_v29 = vpop.permute.xlu1 %438 }
 0x8cb   :  { %1022 = vmatmul.mubr.msk.bf16.vlgmr.msra.gmra.mrb[12].mxu1 %vm220_vm7, %v439_v29 }
 0x8cc   :  { %1026 = vmatpush3.bf16.msra.mxu1 %v1221_v9  ;;  %1029 = vmatprep.mubr.msk.bf16.mxu1 %vm1159_vm0, %v1158_v6 }
 0x8cd   :  { %1027 = vmatprep.subr.bf16.mxu1 %v1158_v6 }
 0x8d0   :  { %1028 = vmatpush3.bf16.msra.mxu1 %v1227_v10 }
 0x8d1   :  { %1041 = vmatprep.subr.bf16.mxu1 %v1158_v6 }
 0x99e   :  { %v477_v31 = vpop.f32.mrb[12].mxu1 }
 0x99f   :  { %v483_v32 = vadd.f32 %v1268_v30, %v477_v31  ;;  %v1023_v33 = vpop.f32.mrb[13].mxu1  ;;  %v25_v30 = vld [vmem:[%s1391_s0 + $0x20] sm:$0xff] }
 0x9a0   :  { %v480_v34 = vpop.f32.mrb[14].mxu1 }
 0x9a1   :  { %1117 = vtanh.f32 %v483_v32  ;;  %v1024_v35 = vpop.f32.mrb[15].mxu1  ;;  %v917_v37 = vmul.f32 -1.442695, %v483_v32 }
 0x9a3   :  { %1119 = vpow2.f32 %v917_v37 }
 0x9ab   :  { %v1118_v36 = vpop.eup %1117 }
 0x9ac   :  { %493 = vrot.lane.b32.xlu0 %v1118_v36, %s1161_s1 }
 0x9ad   :  { %v1120_v38 = vpop.eup %1119 }
 0x9ae   :  { %v487_v39 = vadd.f32 1.0, %v1120_v38 }
 0x9b0   :  { %1121 = vrcp.f32 %v487_v39 }
 0x9ba   :  { %v1122_v40 = vpop.eup %1121 }
 0x9bb   :  { %v491_v44 = vmul.f32 %v1122_v40, %v428_v21 }
 0xa1e   :  { %v494_v41 = vpop.permute.xlu0 %493 }
 0xa1f   :  { %v496_v42 = vmul.f32 %v1122_v40, %v494_v41 }
 0xa21   :  { %498 = vrot.lane.b32.xlu1 %v496_v42, %s1162_s20 }
 0xa25   :  { %44 = vperm.xlu1 %1082, %v25_v30  }
 0xa29   :  { %50 = vperm.xlu1 %1082, %v27_v43  }
 0xa93   :  { %v499_v45 = vpop.permute.xlu1 %498 }
 0xa94   :  { %v501_v46 = vadd.f32 %v499_v45, %v491_v44 }
 0xa96   :  { %1123 = vtanh.f32 %v501_v46 }
 0xaa0   :  { %v1124_v47 = vpop.eup %1123 }
 0xaa1   :  { %504 = vrot.lane.b32.xlu0 %v1124_v47, %s1161_s1 }
 0xaa4   :  { %v45_v54 = vpop.permute.xlu1 %44 }
 0xaa5   :  { %47 = vperm.xlu0 %1081, %v26_v48   ;;  %vm59_vm8 = vcmp.eq.s32.totalorder %v45_v54, %v1254_v19 }
 0xaa8   :  { %v51_v56 = vpop.permute.xlu1 %50 }
 0xaa9   :  { %53 = vperm.xlu0 %1081, %v28_v49   ;;  %vm61_vm11 = vcmp.eq.s32.totalorder %v51_v56, %v1254_v19 }
 0xb13   :  { %v505_v50 = vpop.permute.xlu0 %504 }
 0xb14   :  { %v507_v51 = vmul.f32 %v1122_v40, %v505_v50 }
 0xb16   :  { %v508_v52 = vadd.f32 %v507_v51, %v435_v27  ;;  %v509_v53 = vpack.c.bf16 %v507_v51, %v507_v51 }
 0xb18   :  { %511 = vrot.lane.b32.xlu1 %v509_v53, %s1162_s20 }
 0xb24   :  { %v48_v55 = vpop.permute.xlu0 %47 }
 0xb25   :  { %vm60_vm9 = vcmp.eq.s32.totalorder %v48_v55, %v1254_v19 }
 0xb26   :  { %vm905_vm10 = vmpackc.low %vm60_vm9, %vm59_vm8 }
 0xb27   :  { %989 = vmatprep.mubr.msk.bf16.mxu0 %vm905_vm10, %v1160_v22 }
 0xb28   :  { %v54_v57 = vpop.permute.xlu0 %53 }
 0xb29   :  { %vm62_vm12 = vcmp.eq.s32.totalorder %v54_v57, %v1254_v19 }
 0xb2a   :  { %vm907_vm13 = vmpackc.low %vm62_vm12, %vm61_vm11 }
 0xb2b   :  { %990 = vmatmul.mubr.msk.bf16.gmra.mrb[4].mxu0 %vm907_vm13, %v1160_v22 }
 0xb2c   :  { %1037 = vmatprep.mubr.msk.bf16.mxu0 %vm1159_vm0, %v1158_v6 }
 0xb8a   :  { %v512_v58 = vpop.permute.xlu1 %511 }
 0xb8b   :  { %1030 = vmatmul.mubr.msk.bf16.vlgmr.msra.gmra.mrb[16].mxu1 %vm220_vm7, %v512_v58 }
 0xb8c   :  { %1042 = vmatpush3.bf16.msra.mxu1 %v1221_v9  ;;  %1045 = vmatprep.mubr.msk.bf16.mxu1 %vm1159_vm0, %v1158_v6 }
 0xb8d   :  { %1043 = vmatprep.subr.bf16.mxu1 %v1158_v6 }
 0xb90   :  { %1044 = vmatpush3.bf16.msra.mxu1 %v1227_v10 }
 0xbfe   :  { %v1340_v59 = vpop.f32.mrb[4].mxu0 }
 0xbff   :  { %v189_v19 = vpop.f32.mrb[5].mxu0 }
 0xc00   :  { %v1342_v60 = vpop.f32.mrb[6].mxu0 }
 0xc01   :  { %v192_v22 = vpop.f32.mrb[7].mxu0 }
 0xc5e   :  { %v550_v61 = vpop.f32.mrb[16].mxu1 }
 0xc5f   :  { %v556_v62 = vadd.f32 %v550_v61, %v189_v19  ;;  %v1031_v63 = vpop.f32.mrb[17].mxu1 }
 0xc60   :  { %v553_v0 = vpop.f32.mrb[18].mxu1 }
 0xc61   :  { %1125 = vtanh.f32 %v556_v62  ;;  %v1032_v1 = vpop.f32.mrb[19].mxu1  ;;  %v919_v3 = vmul.f32 -1.442695, %v556_v62 }
 0xc63   :  { %1127 = vpow2.f32 %v919_v3 }
 0xc6b   :  { %v1126_v2 = vpop.eup %1125 }
 0xc6c   :  { %566 = vrot.lane.b32.xlu0 %v1126_v2, %s1161_s1 }
 0xc6d   :  { %v1128_v4 = vpop.eup %1127 }
 0xc6e   :  { %v560_v5 = vadd.f32 1.0, %v1128_v4 }
 0xc70   :  { %1129 = vrcp.f32 %v560_v5 }
 0xc7a   :  { %v1130_v7 = vpop.eup %1129 }
 0xc7b   :  { %v564_v12 = vmul.f32 %v1130_v7, %v501_v46 }
 0xcde   :  { %v567_v8 = vpop.permute.xlu0 %566 }
 0xcdf   :  { %v569_v11 = vmul.f32 %v1130_v7, %v567_v8 }
 0xce1   :  { %571 = vrot.lane.b32.xlu1 %v569_v11, %s1162_s20 }
 0xd53   :  { %v572_v13 = vpop.permute.xlu1 %571 }
 0xd54   :  { %v574_v14 = vadd.f32 %v572_v13, %v564_v12 }
 0xd56   :  { %1131 = vtanh.f32 %v574_v14 }
 0xd60   :  { %v1132_v15 = vpop.eup %1131 }
 0xd61   :  { %577 = vrot.lane.b32.xlu0 %v1132_v15, %s1161_s1  ;;  %v802_v15 = vld [vmem:[%s1394_s3] sm:$0xff] }
 0xdd3   :  { %v578_v16 = vpop.permute.xlu0 %577 }
 0xdd4   :  { %v580_v17 = vmul.f32 %v1130_v7, %v578_v16  ;;  %v803_v16 = vld [vmem:[%s1394_s3 + $0x8] sm:$0xff] }
 0xdd6   :  { %v581_v18 = vadd.f32 %v580_v17, %v508_v52  ;;  %v582_v20 = vpack.c.bf16 %v580_v17, %v580_v17  ;;  %v804_v17 = vld [vmem:[%s1394_s3 + $0x10] sm:$0xff] }
 0xdd8   :  { %584 = vrot.lane.b32.xlu1 %v582_v20, %s1162_s20  ;;  %v805_v20 = vld [vmem:[%s1394_s3 + $0x18] sm:$0xff] }
 0xe4a   :  { %v585_v21 = vpop.permute.xlu1 %584 }
 0xe4b   :  { %1038 = vmatmul.mubr.msk.bf16.vlgmr.msra.gmra.mrb[8].mxu0 %vm220_vm7, %v585_v21  ;;  %v1072_v21 = vpack.c.bf16 %v805_v20, %v804_v17 }
 0xe4c   :  { %1050 = vmatpush3.bf16.msra.mxu0 %v1221_v9  ;;  %1053 = vmatprep.mubr.msk.bf16.mxu0 %vm1159_vm0, %v1158_v6 }
 0xe4d   :  { %1051 = vmatprep.subr.bf16.mxu0 %v1158_v6 }
 0xe50   :  { %1052 = vmatpush3.bf16.msra.mxu0 %v1227_v10 }
 0xf1e   :  { %v623_v23 = vpop.f32.mrb[8].mxu0 }
 0xf1f   :  { %v629_v24 = vadd.f32 %v623_v23, %v192_v22  ;;  %v1039_v25 = vpop.f32.mrb[9].mxu0 }
 0xf20   :  { %v626_v26 = vpop.f32.mrb[10].mxu0 }
 0xf21   :  { %1133 = vtanh.f32 %v629_v24  ;;  %v1040_v27 = vpop.f32.mrb[11].mxu0  ;;  %v921_v29 = vmul.f32 -1.442695, %v629_v24 }
 0xf23   :  { %1135 = vpow2.f32 %v921_v29  ;;  %v926_v29 = vld [vmem:[%s1395_s4] ss:$0 sm:$0xff] }
 0xf2b   :  { %v1134_v28 = vpop.eup %1133 }
 0xf2c   :  { %639 = vrot.lane.b32.xlu0 %v1134_v28, %s1161_s1 }
 0xf2d   :  { %v1136_v31 = vpop.eup %1135 }
 0xf2e   :  { %v633_v9 = vadd.f32 1.0, %v1136_v31 }
 0xf30   :  { %1137 = vrcp.f32 %v633_v9 }
 0xf3a   :  { %v1138_v32 = vpop.eup %1137 }
 0xf3b   :  { %v637_v10 = vmul.f32 %v1138_v32, %v574_v14  ;;  %v1163_v14 = vmov 0.0|0.0  }
 0xf3c   :  { %1068 = vmatprep.subr.bf16.mxu1 %v1163_v14 }
 0xf9e   :  { %v640_v33 = vpop.permute.xlu0 %639 }
 0xf9f   :  { %v642_v34 = vmul.f32 %v1138_v32, %v640_v33 }
 0xfa1   :  { %644 = vrot.lane.b32.xlu1 %v642_v34, %s1162_s20 }
0x1013   :  { %v645_v35 = vpop.permute.xlu1 %644 }
0x1014   :  { %v647_v36 = vadd.f32 %v645_v35, %v637_v10 }
0x1016   :  { %1139 = vtanh.f32 %v647_v36 }
0x1020   :  { %v1140_v37 = vpop.eup %1139 }
0x1021   :  { %650 = vrot.lane.b32.xlu0 %v1140_v37, %s1161_s1 }
0x1093   :  { %v651_v38 = vpop.permute.xlu0 %650 }
0x1094   :  { %v653_v39 = vmul.f32 %v1138_v32, %v651_v38 }
0x1096   :  { %v654_v40 = vadd.f32 %v653_v39, %v581_v18  ;;  %v655_v41 = vpack.c.bf16 %v653_v39, %v653_v39  ;;  %v1069_v18 = vpack.c.bf16 %v803_v16, %v802_v15 }
0x1098   :  { %657 = vrot.lane.b32.xlu1 %v655_v41, %s1162_s20 }
0x110a   :  { %v658_v42 = vpop.permute.xlu1 %657 }
0x110b   :  { %1046 = vmatmul.mubr.msk.bf16.vlgmr.msra.gmra.mrb[20].mxu1 %vm220_vm7, %v658_v42 }
0x110c   :  { %1065 = vmatprep.mubr.msk.f32.mxu1 %vm1159_vm0, %v1158_v6  ;;  %1070 = vmatpush3.bf16.msra.mxu1 %v1069_v18 }
0x110d   :  { %1071 = vmatprep.subr.bf16.mxu1 %v1163_v14 }
0x1110   :  { %1073 = vmatpush3.bf16.msra.mxu1 %v1072_v21 }
0x11de   :  { %v696_v30 = vpop.f32.mrb[20].mxu1 }
0x11df   :  { %v702_v43 = vadd.f32 %v1340_v59, %v696_v30  ;;  %v1047_v44 = vpop.f32.mrb[21].mxu1 }
0x11e0   :  { %v699_v45 = vpop.f32.mrb[22].mxu1 }
0x11e1   :  { %1141 = vtanh.f32 %v702_v43  ;;  %v1048_v46 = vpop.f32.mrb[23].mxu1  ;;  %v923_v48 = vmul.f32 -1.442695, %v702_v43 }
0x11e3   :  { %1143 = vpow2.f32 %v923_v48 }
0x11eb   :  { %v1142_v47 = vpop.eup %1141 }
0x11ec   :  { %712 = vrot.lane.b32.xlu0 %v1142_v47, %s1161_s1 }
0x11ed   :  { %v1144_v49 = vpop.eup %1143 }
0x11ee   :  { %v706_v50 = vadd.f32 1.0, %v1144_v49 }
0x11f0   :  { %1145 = vrcp.f32 %v706_v50 }
0x11fa   :  { %v1146_v51 = vpop.eup %1145 }
0x11fb   :  { %v710_v6 = vmul.f32 %v1146_v51, %v647_v36 }
0x125e   :  { %v713_v52 = vpop.permute.xlu0 %712 }
0x125f   :  { %v715_v53 = vmul.f32 %v1146_v51, %v713_v52 }
0x1261   :  { %717 = vrot.lane.b32.xlu1 %v715_v53, %s1162_s20 }
0x12d3   :  { %v718_v54 = vpop.permute.xlu1 %717 }
0x12d4   :  { %v720_v55 = vadd.f32 %v718_v54, %v710_v6 }
0x12d6   :  { %1147 = vtanh.f32 %v720_v55 }
0x12e0   :  { %v1148_v56 = vpop.eup %1147 }
0x12e1   :  { %723 = vrot.lane.b32.xlu0 %v1148_v56, %s1161_s1 }
0x1353   :  { %v724_v57 = vpop.permute.xlu0 %723 }
0x1354   :  { %v726_v58 = vmul.f32 %v1146_v51, %v724_v57 }
0x1356   :  { %v727_v59 = vadd.f32 %v726_v58, %v654_v40  ;;  %v728_v19 = vpack.c.bf16 %v726_v58, %v726_v58 }
0x1358   :  { %730 = vrot.lane.b32.xlu1 %v728_v19, %s1162_s20 }
0x13ca   :  { %v731_v22 = vpop.permute.xlu1 %730 }
0x13cb   :  { %1054 = vmatmul.mubr.msk.bf16.vlgmr.msra.gmra.mrb[12].mxu0 %vm220_vm7, %v731_v22 }
0x149e   :  { %v769_v61 = vpop.f32.mrb[12].mxu0 }
0x149f   :  { %v775_v62 = vadd.f32 %v1342_v60, %v769_v61  ;;  %v1055_v63 = vpop.f32.mrb[13].mxu0 }
0x14a0   :  { %v772_v0 = vpop.f32.mrb[14].mxu0 }
0x14a1   :  { %1149 = vtanh.f32 %v775_v62  ;;  %v1056_v1 = vpop.f32.mrb[15].mxu0  ;;  %v925_v3 = vmul.f32 -1.442695, %v775_v62 }
0x14a3   :  { %1151 = vpow2.f32 %v925_v3 }
0x14ab   :  { %v1150_v2 = vpop.eup %1149 }
0x14ac   :  { %785 = vrot.lane.b32.xlu0 %v1150_v2, %s1161_s1 }
0x14ad   :  { %v1152_v4 = vpop.eup %1151 }
0x14ae   :  { %v779_v5 = vadd.f32 1.0, %v1152_v4 }
0x14b0   :  { %1153 = vrcp.f32 %v779_v5 }
0x14ba   :  { %v1154_v7 = vpop.eup %1153 }
0x14bb   :  { %v783_v12 = vmul.f32 %v1154_v7, %v720_v55 }
0x151e   :  { %v786_v8 = vpop.permute.xlu0 %785 }
0x151f   :  { %v788_v11 = vmul.f32 %v1154_v7, %v786_v8 }
0x1521   :  { %790 = vrot.lane.b32.xlu1 %v788_v11, %s1162_s20 }
0x1593   :  { %v791_v13 = vpop.permute.xlu1 %790 }
0x1594   :  { %v793_v60 = vadd.f32 %v791_v13, %v783_v12 }
0x1596   :  { %1155 = vtanh.f32 %v793_v60 }
0x15a0   :  { %v1156_v23 = vpop.eup %1155 }
0x15a1   :  { %796 = vrot.lane.b32.xlu0 %v1156_v23, %s1161_s1 }
0x1613   :  { %v797_v24 = vpop.permute.xlu0 %796 }
0x1614   :  { %v799_v25 = vmul.f32 %v1154_v7, %v797_v24 }
0x1616   :  { %v800_v26 = vadd.f32 %v799_v25, %v727_v59 }
0x1618   :  { %v801_v27 = vmul.f32 0.125, %v800_v26 }
0x161a   :  { %814 = vrot.lane.b32.xlu1 %v801_v27, %s1162_s20 }
0x168c   :  { %v815_v28 = vpop.permute.xlu1 %814 }
0x168d   :  { %1066 = vmatmul.mubr.msk.f32.vlgmr.msra.gmra.mrb[24].mxu1 %vm220_vm7, %v815_v28 }
0x1760   :  { %v884_v31 = vpop.f32.mrb[24].mxu1 }
0x1761   :  { %v885_v9 = vadd.f32 %v926_v29, %v884_v31  ;;  %v1067_v32 = vpop.f32.mrb[25].mxu1 }
0x1763   :  { %888 = vst [vmem:[%s1396_s5] sm:$0xff] %v885_v9 }

</bundles_post_ra>
